<compile_context>
chip_gen: v5e
topology: v5e:2x2
jax: 0.10.0
libtpu: 0.0.40
codegen_flags: <defaults>
</compile_context>

<pallas_src>
import math
import functools

import jax
import jax.numpy as jnp
from jax.experimental import pallas as pl
from jax.experimental.pallas import tpu as pltpu


def _spatial_emb_kernel(x_ref, w_ref, b_ref, o_ref):
    # Fused (Linear + eval-BatchNorm [+ scale]) as a single affine, then ReLU.
    y = jnp.dot(x_ref[...], w_ref[...], preferred_element_type=jnp.float32)
    y = y + b_ref[...].astype(jnp.float32)   # (1, P*D_out) broadcast, f32 epilogue
    o_ref[...] = jnp.maximum(y, 0.0).astype(o_ref.dtype)


def _pack_factor(d_in, d_out, dtype_bytes=4, max_w_bytes=2 << 20):
    """Smallest P so P*d_in and P*d_out are lane-dense (multiples of 128)."""
    p_in = 128 // math.gcd(d_in, 128)
    p_out = 128 // math.gcd(d_out, 128)
    p = (p_in * p_out) // math.gcd(p_in, p_out)        # lcm
    if p * d_in * p * d_out * dtype_bytes > max_w_bytes:
        return 1                                        # block-diag weight too big
    return p


def fold_spatial_embedding_params(params, *, scale=False, eps=1e-5, stream_dtype=None):
    """One-time weight prep: fold eval-BN (+ optional sqrt(D) scale) into Linear,
    transpose, and build the block-diagonal lane-packed weight/bias."""
    W = params["W"]                 # [D_out, D_in] (PyTorch nn.Linear layout)
    b = params["b"]                 # [D_out]
    gamma = params["gamma"]
    beta = params["beta"]
    r_mean = params["running_mean"]
    r_var = params["running_var"]
    D_out, D_in = W.shape

    # y = relu(((x@W^T + b) - mean) * g/sqrt(var+eps) + beta) [* c]
    #   = relu(x @ (W^T * s) + ((b - mean) * s + beta))       [s folded with c > 0]
    s = gamma * jax.lax.rsqrt(r_var + eps)
    if scale:
        c = jnp.float32(math.sqrt(D_out))                 # c > 0: commutes with ReLU
        s_w = s * c
        b_f = ((b - r_mean) * s + beta) * c
    else:
        s_w = s
        b_f = (b - r_mean) * s + beta
    W_f = W.T * s_w[None, :]                              # [D_in, D_out]

    P = _pack_factor(D_in, D_out)
    W_p = jnp.kron(jnp.eye(P, dtype=W_f.dtype), W_f)      # [P*D_in, P*D_out] block-diag
    b_p = jnp.tile(b_f, P).reshape(1, P * D_out)          # [1, P*D_out], kept f32
    if stream_dtype is not None:
        W_p = W_p.astype(stream_dtype)                    # e.g. bf16 streaming
    return {"W_p": W_p, "b_p": b_p}


@functools.partial(jax.jit, static_argnames=("tm", "min_steps"))
def spatial_embeddings_forward(x, mask, folded, *, tm=2048, min_steps=4):
    """x: [B, T, D_in]; mask: [B, T] (unused in eval-mode BatchNorm)."""
    del mask  # eval-mode BatchNorm ignores the frame mask
    B, T, D_in = x.shape
    W_p = folded["W_p"]
    b_p = folded["b_p"]
    Din_p, Dout_p = W_p.shape
    P = Din_p // D_in
    D_out = Dout_p // P

    # ---- Packing: pad B*T only to a multiple of P (<= P-1 rows, often none) ----
    M = B * T
    m_pack = pl.cdiv(M, P)
    m_pad = m_pack * P
    x2 = x.reshape(M, D_in)
    if m_pad != M:
        x2 = jnp.pad(x2, ((0, m_pad - M), (0, 0)))        # tiny, fused under jit
    x_p = x2.reshape(m_pack, Din_p)
    if x_p.dtype != W_p.dtype:
        x_p = x_p.astype(W_p.dtype)                       # optional bf16 stream

    # ---- Row tile: big for BW, but keep >= min_steps grid steps for megacore ----
    if m_pack >= 8:
        tm_cap = ((pl.cdiv(m_pack, min_steps) + 7) // 8) * 8   # multiple of 8
        tm_eff = max(8, min(tm, tm_cap))
    else:
        tm_eff = m_pack                                    # single full-extent block
    grid = (pl.cdiv(m_pack, tm_eff),)                      # ragged last block is fine

    full = lambda i: (0, 0)  # parameters: single resident block across the grid
    out_p = pl.pallas_call(
        _spatial_emb_kernel,
        out_shape=jax.ShapeDtypeStruct((m_pack, Dout_p), x.dtype),
        grid_spec=pltpu.PrefetchScalarGridSpec(
            num_scalar_prefetch=0,
            grid=grid,
            in_specs=[
                pl.BlockSpec((tm_eff, Din_p), lambda i: (i, 0)),  # packed x rows
                pl.BlockSpec((Din_p, Dout_p), full),              # block-diag fused W
                pl.BlockSpec((1, Dout_p), full),                  # fused bias
            ],
            out_specs=pl.BlockSpec((tm_eff, Dout_p), lambda i: (i, 0)),
        ),
        compiler_params=pltpu.CompilerParams(
            dimension_semantics=("parallel",)),
    )(x_p, W_p, b_p)

    # Un-pack: [m_pack, P*D_out] -> [m_pad, D_out] -> drop (at most P-1) pad rows.
    out2 = out_p.reshape(m_pad, D_out)
    if m_pad != M:
        out2 = out2[:M]
    return out2.reshape(B, T, D_out)


def _reference(x, params, *, scale=False, eps=1e-5):
    y = jnp.einsum("btd,ed->bte", x, params["W"]) + params["b"]
    y = (y - params["running_mean"]) / jnp.sqrt(params["running_var"] + eps)
    y = y * params["gamma"] + params["beta"]
    y = jnp.maximum(y, 0.0)
    if scale:
        y = y * math.sqrt(params["W"].shape[0])
    return y


if __name__ == "__main__":
    # Small shapes consistent with the module: frame features [B, T, input_size]
    B, T = 2, 8
    input_size = 32
    embedding_dim = 64

    key = jax.random.PRNGKey(0)
    kx, kw, kb, kg, kbeta, kmean, kvar, kx2 = jax.random.split(key, 8)

    x = jax.random.normal(kx, (B, T, input_size), dtype=jnp.float32)
    mask = jnp.ones((B, T), dtype=jnp.float32)  # frame mask (unused in eval)

    bound = 1.0 / math.sqrt(input_size)
    params = {
        "W": jax.random.uniform(kw, (embedding_dim, input_size),
                                minval=-bound, maxval=bound, dtype=jnp.float32),
        "b": jax.random.uniform(kb, (embedding_dim,),
                                minval=-bound, maxval=bound, dtype=jnp.float32),
        "gamma": 1.0 + 0.1 * jax.random.normal(kg, (embedding_dim,), dtype=jnp.float32),
        "beta": 0.1 * jax.random.normal(kbeta, (embedding_dim,), dtype=jnp.float32),
        "running_mean": 0.1 * jax.random.normal(kmean, (embedding_dim,), dtype=jnp.float32),
        "running_var": 1.0 + 0.1 * jax.random.uniform(kvar, (embedding_dim,), dtype=jnp.float32),
    }

    # One-time weight prep (hoisted out of the per-call path).
    folded = fold_spatial_embedding_params(params, scale=False)

    out = jax.block_until_ready(spatial_embeddings_forward(x, mask, folded))
    ref = _reference(x, params, scale=False)
    assert out.shape == (B, T, embedding_dim)
    assert jnp.allclose(out, ref, atol=1e-4, rtol=1e-4), "mismatch vs. reference"

    # scale=True path (sqrt(D) folded into the weights).
    folded_s = fold_spatial_embedding_params(params, scale=True)
    out_s = jax.block_until_ready(spatial_embeddings_forward(x, mask, folded_s))
    ref_s = _reference(x, params, scale=True)
    assert jnp.allclose(out_s, ref_s, atol=1e-4, rtol=1e-4), "scale path mismatch"

    # Ragged case: B*T not a multiple of P and not a multiple of the row tile,
    # exercising the small P-pad + partial last grid block (no big padding).
    B2, T2 = 2, 75
    x2 = jax.random.normal(kx2, (B2, T2, input_size), dtype=jnp.float32)
    mask2 = jnp.ones((B2, T2), dtype=jnp.float32)
    out2 = jax.block_until_ready(spatial_embeddings_forward(x2, mask2, folded))
    ref2 = _reference(x2, params, scale=False)
    assert out2.shape == (B2, T2, embedding_dim)
    assert jnp.allclose(out2, ref2, atol=1e-4, rtol=1e-4), "ragged-edge mismatch"

    print("KERNEL_OK")
</pallas_src>

<mosaic_0001>
module attributes {stable_mosaic.version = 11 : i64} {
  func.func @_spatial_emb_kernel(%arg0: i32, %arg1: memref<4x128xf32, #tpu.memory_space<vmem>>, %arg2: memref<128x256xf32, #tpu.memory_space<vmem>>, %arg3: memref<1x256xf32, #tpu.memory_space<vmem>>, %arg4: memref<4x256xf32, #tpu.memory_space<vmem>>) attributes {dimension_semantics = [#tpu.dimension_semantics<parallel>], iteration_bounds = array<i64: 1>, scalar_prefetch = 0 : i64, scratch_operands = 0 : i64, tpu.core_type = #tpu.core_type<tc>, window_params = [{transform_indices = @transform_0, window_bounds = array<i64: 4, 128>}, {pipeline_mode = #tpu.pipeline_mode<synchronous>, transform_indices = @transform_1, window_bounds = array<i64: 128, 256>}, {pipeline_mode = #tpu.pipeline_mode<synchronous>, transform_indices = @transform_2, window_bounds = array<i64: 1, 256>}, {transform_indices = @transform_3, window_bounds = array<i64: 4, 256>}]} {
    %c0 = arith.constant 0 : index
    %c0_0 = arith.constant 0 : index
    %0 = vector.load %arg1[%c0, %c0_0] : memref<4x128xf32, #tpu.memory_space<vmem>>, vector<4x128xf32>
    %c0_1 = arith.constant 0 : index
    %c0_2 = arith.constant 0 : index
    %1 = vector.load %arg2[%c0_1, %c0_2] : memref<128x256xf32, #tpu.memory_space<vmem>>, vector<128x256xf32>
    %cst = arith.constant dense<0.000000e+00> : vector<4x256xf32>
    %2 = tpu.matmul %0, %1, %cst {dimension_numbers = #tpu.dot_dimension_numbers<[1], [0], [0], [1], [0, 0, 1, 1], [], []>} : vector<4x128xf32>, vector<128x256xf32>, vector<4x256xf32> -> vector<4x256xf32>
    %c0_3 = arith.constant 0 : index
    %c0_4 = arith.constant 0 : index
    %3 = vector.load %arg3[%c0_3, %c0_4] : memref<1x256xf32, #tpu.memory_space<vmem>>, vector<1x256xf32>
    %4 = vector.broadcast %3 : vector<1x256xf32> to vector<4x256xf32>
    %5 = arith.addf %2, %4 : vector<4x256xf32>
    %cst_5 = arith.constant 0.000000e+00 : f32
    %6 = vector.broadcast %cst_5 : f32 to vector<4x256xf32>
    %7 = arith.maximumf %5, %6 : vector<4x256xf32>
    %c0_6 = arith.constant 0 : index
    %c0_7 = arith.constant 0 : index
    %8 = vector.load %arg4[%c0_6, %c0_7] : memref<4x256xf32, #tpu.memory_space<vmem>>, vector<4x256xf32>
    tpu.vector_store %arg4[%c0_6, %c0_7], %7 {strides = array<i32>} : memref<4x256xf32, #tpu.memory_space<vmem>>, vector<4x256xf32>,
    return
  }
  func.func @transform_0(%arg0: i32) -> (i32, i32) {
    %c0_i32 = arith.constant 0 : i32
    %c0_i32_0 = arith.constant 0 : i32
    return %arg0, %c0_i32 : i32, i32
  }
  func.func @transform_1(%arg0: i32) -> (i32, i32) {
    %c0_i32 = arith.constant 0 : i32
    %c0_i32_0 = arith.constant 0 : i32
    %c0_i32_1 = arith.constant 0 : i32
    return %c0_i32, %c0_i32_0 : i32, i32
  }
  func.func @transform_2(%arg0: i32) -> (i32, i32) {
    %c0_i32 = arith.constant 0 : i32
    %c0_i32_0 = arith.constant 0 : i32
    %c0_i32_1 = arith.constant 0 : i32
    return %c0_i32, %c0_i32_0 : i32, i32
  }
  func.func @transform_3(%arg0: i32) -> (i32, i32) {
    %c0_i32 = arith.constant 0 : i32
    %c0_i32_0 = arith.constant 0 : i32
    return %arg0, %c0_i32 : i32, i32
  }
}

</mosaic_0001>

<bundles_post_ra>
// kernel: spatial_embeddings_forward.1
= control target key start
LH: loop header
LB: loop body
LE: loop exit
PB: predicated region body
PF: predicated region fallthrough
CT: control target
= control target key end

     0   :  { %8 = vsyncpa [#allocation3], 0  ;;  %s152_s15 = smov [#allocation2]   ;;  %s153_s17 = smov 256   ;;  %s187_s0 = inlined_call_operand.vmem [shape: f32[4,128], index: 0, kind: input, shape index: {}]   ;;  %s188_s1 = inlined_call_operand.hbm [shape: f32[128,256], index: 1, kind: input, shape index: {}]   ;;  %s189_s2 = inlined_call_operand.vmem [shape: f32[1,256], index: 2, kind: input, shape index: {}]   ;;  %s190_s3 = inlined_call_operand.vmem [shape: f32[4,256], index: 3, kind: output, shape index: {}]  }
   0x1   :  { %s15_s14 = sshll.u32 %s188_s1, 4  ;;  %s17_s16 = sshll.u32 %s152_s15, 4  ;;  %s16_s14 = int_to_ptr.hbm [resolvable:$true] %s15_s14  ;;  %s18_s16 = int_to_ptr.vmem [resolvable:$true] %s17_s16 }
   0x2   :  { %s154_s18 = smov 16  }
   0x3   :  { %23 = dma.hbm_to_vmem [thread:$0]  %s16_s14, 4096, %s18_s16, [#allocation3], %s153_s17, %s153_s17, %s154_s18  }
   0x4   :  { %150 = dma.done.wait [#allocation3], 4096  }
   0x5   :  { %151 = vsyncadd [#allocation3], 4294963200  ;;  %v62_v0 = vld [vmem:[#allocation2 + $0xf8] sm:$0xff]  ;;  %v61_v1 = vld [vmem:[#allocation2 + $0xf0] sm:$0xff]  ;;  %vm114_vm0 = vcmask 1043456  }
   0x6   :  { %v60_v2 = vld [vmem:[#allocation2 + $0xe8] sm:$0xff]  ;;  %89 = vmatpush.msra.mxu1 %v62_v0  ;;  %69 = vmatpush.msra.mxu0 %v61_v1  ;;  %v59_v3 = vld [vmem:[#allocation2 + $0xe0] sm:$0xff]  ;;  %v58_v4 = vld [vmem:[#allocation2 + $0xd8] sm:$0xff] }
   0x7   :  { %v57_v5 = vld [vmem:[#allocation2 + $0xd0] sm:$0xff]  ;;  %v56_v6 = vld [vmem:[#allocation2 + $0xc8] sm:$0xff]  ;;  %v55_v7 = vld [vmem:[#allocation2 + $0xc0] sm:$0xff] }
   0x8   :  { %90 = vmatpush.msra.mxu1 %v60_v2  ;;  %70 = vmatpush.msra.mxu0 %v59_v3  ;;  %v54_v8 = vld [vmem:[#allocation2 + $0xb8] sm:$0xff]  ;;  %v53_v9 = vld [vmem:[#allocation2 + $0xb0] sm:$0xff]  ;;  %v52_v10 = vld [vmem:[#allocation2 + $0xa8] sm:$0xff] }
   0x9   :  { %v51_v11 = vld [vmem:[#allocation2 + $0xa0] sm:$0xff]  ;;  %v50_v12 = vld [vmem:[#allocation2 + $0x98] sm:$0xff]  ;;  %v49_v13 = vld [vmem:[#allocation2 + $0x90] sm:$0xff] }
   0xa   :  { %91 = vmatpush.msra.mxu1 %v58_v4  ;;  %71 = vmatpush.msra.mxu0 %v57_v5  ;;  %v48_v14 = vld [vmem:[#allocation2 + $0x88] sm:$0xff]  ;;  %v47_v15 = vld [vmem:[#allocation2 + $0x80] sm:$0xff]  ;;  %v46_v16 = vld [vmem:[#allocation2 + $0x78] sm:$0xff] }
   0xb   :  { %v45_v17 = vld [vmem:[#allocation2 + $0x70] sm:$0xff]  ;;  %v44_v18 = vld [vmem:[#allocation2 + $0x68] sm:$0xff]  ;;  %v43_v19 = vld [vmem:[#allocation2 + $0x60] sm:$0xff] }
   0xc   :  { %92 = vmatpush.msra.mxu1 %v56_v6  ;;  %72 = vmatpush.msra.mxu0 %v55_v7  ;;  %v42_v20 = vld [vmem:[#allocation2 + $0x58] sm:$0xff]  ;;  %v41_v21 = vld [vmem:[#allocation2 + $0x50] sm:$0xff]  ;;  %v40_v22 = vld [vmem:[#allocation2 + $0x48] sm:$0xff] }
   0xd   :  { %v39_v23 = vld [vmem:[#allocation2 + $0x40] sm:$0xff]  ;;  %v38_v24 = vld [vmem:[#allocation2 + $0x38] sm:$0xff]  ;;  %v37_v25 = vld [vmem:[#allocation2 + $0x30] sm:$0xff] }
   0xe   :  { %93 = vmatpush.msra.mxu1 %v54_v8  ;;  %73 = vmatpush.msra.mxu0 %v53_v9  ;;  %v36_v26 = vld [vmem:[#allocation2 + $0x28] sm:$0xff]  ;;  %v35_v27 = vld [vmem:[#allocation2 + $0x20] sm:$0xff]  ;;  %v34_v28 = vld [vmem:[#allocation2 + $0x18] sm:$0xff] }
   0xf   :  { %v33_v29 = vld [vmem:[#allocation2 + $0x10] sm:$0xff]  ;;  %v32_v30 = vld [vmem:[#allocation2 + $0x8] sm:$0xff]  ;;  %v31_v31 = vld [vmem:[#allocation2] sm:$0xff] }
  0x10   :  { %94 = vmatpush.msra.mxu1 %v52_v10  ;;  %74 = vmatpush.msra.mxu0 %v51_v11  ;;  %v30_v32 = vld [vmem:[%s187_s0] sm:$0xf] }
  0x11   :  { %v63_v33 = vld [vmem:[%s189_s2] sm:$0x3] }
  0x12   :  { %95 = vmatpush.msra.mxu1 %v50_v12  ;;  %75 = vmatpush.msra.mxu0 %v49_v13  ;;  %v66_v34 = vperm.slane %v63_v33, 1  ;;  %v65_v35 = vperm.slane %v63_v33, 0 }
  0x14   :  { %96 = vmatpush.msra.mxu1 %v48_v14  ;;  %76 = vmatpush.msra.mxu0 %v47_v15 }
  0x16   :  { %97 = vmatpush.msra.mxu1 %v46_v16  ;;  %77 = vmatpush.msra.mxu0 %v45_v17 }
  0x18   :  { %98 = vmatpush.msra.mxu1 %v44_v18  ;;  %78 = vmatpush.msra.mxu0 %v43_v19 }
  0x1a   :  { %99 = vmatpush.msra.mxu1 %v42_v20  ;;  %79 = vmatpush.msra.mxu0 %v41_v21 }
  0x1c   :  { %100 = vmatpush.msra.mxu1 %v40_v22  ;;  %80 = vmatpush.msra.mxu0 %v39_v23 }
  0x1e   :  { %101 = vmatpush.msra.mxu1 %v38_v24  ;;  %81 = vmatpush.msra.mxu0 %v37_v25 }
  0x20   :  { %102 = vmatpush.msra.mxu1 %v36_v26  ;;  %82 = vmatpush.msra.mxu0 %v35_v27 }
  0x22   :  { %103 = vmatpush.msra.mxu1 %v34_v28  ;;  %83 = vmatpush.msra.mxu0 %v33_v29 }
  0x24   :  { %104 = vmatpush.msra.mxu1 %v32_v30  ;;  %84 = vmatpush.msra.mxu0 %v31_v31 }
  0x25   :  { %105 = vmatmul.f32.vlgmr.msra.gmra.mxu1 %v30_v32  ;;  %85 = vmatmul.f32.vlgmr.msra.gmra.mxu0 %v30_v32 }
  0xa2   :  { %v106_v36 = vpop.f32.mrf.mxu1  ;;  %v86_v37 = vpop.f32.mrf.mxu0 }
  0xa3   :  { %v107_v38 = vadd.f32 %v106_v36, %v66_v34  ;;  %v87_v39 = vadd.f32 %v86_v37, %v65_v35 }
  0xa5   :  { %v110_v40 = vmax.f32 %v107_v38, 0.0  ;;  %v109_v41 = vmax.f32 %v87_v39, 0.0 }
  0xa7   :  { %v113_v42 = vrot.slane %v110_v40, 4 }
  0xa9   :  { %v115_v43 = vsel %vm114_vm0, %v109_v41, %v113_v42 }
  0xaa   :  { %117 = vst [vmem:[%s190_s3] sm:$0xff] %v115_v43 }
  0xab   :  { %122 = vsyncpa [#allocation3], 1 }

</bundles_post_ra>
